<compile_context>
chip_gen: v7x
topology: tpu7x:2x2x1
jax: 0.10.0
libtpu: 0.0.40
codegen_flags: <defaults>
</compile_context>

<pallas_src>
import jax
import jax.numpy as jnp
from jax.experimental import pallas as pl
from jax.experimental.pallas import tpu as pltpu

NEG_SLOPE = 0.01          # torch.nn.LeakyReLU default negative_slope
LANE = 128                # lane width (last dim of every block)
MAX_TILE_BYTES = 2 << 20  # ~2 MiB per block; double-buffered in+out ~= 8 MiB VMEM
MIN_GRID_STEPS = 4        # keep both v7x TensorCores busy on mid-sized inputs
SPLIT_THRESHOLD_BYTES = 1 << 20  # only force multi-step grids for >=1 MiB tensors


def _round_up(a, b):
    return -(-a // b) * b


def _sublane(dtype):
    # Sub-32-bit dtypes pack along sublanes: 8 rows for 4B, 16 for 2B, 32 for 1B.
    return {4: 8, 2: 16, 1: 32}.get(jnp.dtype(dtype).itemsize, 8)


def a_forward_kernel(params_ref, x_ref, o_ref):
    # params_ref: SMEM f32[8] = [w_jl, b_jl, w_tp, b_tp, w_qkv, b_qkv, w_c, b_c]
    # x_ref/o_ref: (tile_rows, 128) VMEM tiles; pure VPU elementwise chain.
    w_jl = params_ref[0]
    b_jl = params_ref[1]
    w_tp = params_ref[2]
    b_tp = params_ref[3]
    w_qkv = params_ref[4]
    b_qkv = params_ref[5]
    w_c = params_ref[6]
    b_c = params_ref[7]

    x = x_ref[...].astype(jnp.float32)

    # TimeEmbedding branch: lrelu(w_tp*x + b_tp)
    t = x * w_tp + b_tp
    t = jnp.where(t >= 0, t, NEG_SLOPE * t)

    # just_linear branch + sum
    z = x * w_jl + b_jl + t

    # Attention: C(lrelu(QKV(z)))
    h = z * w_qkv + b_qkv
    h = jnp.where(h >= 0, h, NEG_SLOPE * h)
    y = h * w_c + b_c

    o_ref[...] = y.astype(o_ref.dtype)


def a_forward(x, w_jl, b_jl, w_tp, b_tp, w_qkv, b_qkv, w_c, b_c):
    """Forward pass of module A. x: (..., 1), any float dtype. Returns same shape/dtype."""
    orig_shape = x.shape
    out_dtype = x.dtype
    n = x.size
    itemsize = jnp.dtype(out_dtype).itemsize
    sublane = _sublane(out_dtype)

    # --- lane-dense 2-D slab -------------------------------------------------
    if n % LANE == 0:
        # Fast path: flatten/reshape only (metadata ops) -> no extra HBM pass.
        rows = n // LANE
        x2d = x.reshape(rows, LANE)
        needs_unpad = False
    else:
        # General path: zero-pad the tail so the slab is (rows, 128).
        rows = max(_round_up(pl.cdiv(n, LANE), sublane), sublane)
        flat = jnp.pad(x.reshape(-1), (0, rows * LANE - n))
        x2d = flat.reshape(rows, LANE)
        needs_unpad = True

    # --- tile selection ------------------------------------------------------
    # ~2 MiB per block, rounded down to a sublane multiple.
    max_tile_rows = max((MAX_TILE_BYTES // (LANE * itemsize)) // sublane * sublane,
                        sublane)
    tile_rows = min(max_tile_rows, rows)
    # For mid-sized tensors, make sure the grid has >=MIN_GRID_STEPS steps so a
    # "parallel" grid can be sharded across both v7x TensorCores.
    if rows * LANE * itemsize >= SPLIT_THRESHOLD_BYTES and rows >= MIN_GRID_STEPS * sublane:
        tile_rows = min(tile_rows,
                        max(_round_up(pl.cdiv(rows, MIN_GRID_STEPS), sublane), sublane))
    # Legality: tile_rows is either a sublane multiple or equals the full row count.

    grid = (pl.cdiv(rows, tile_rows),)

    # All eight scalar parameters in one SMEM f32 vector.
    params = jnp.concatenate([
        w_jl.reshape(-1), b_jl.reshape(-1),
        w_tp.reshape(-1), b_tp.reshape(-1),
        w_qkv.reshape(-1), b_qkv.reshape(-1),
        w_c.reshape(-1), b_c.reshape(-1),
    ]).astype(jnp.float32)

    out2d = pl.pallas_call(
        a_forward_kernel,
        out_shape=jax.ShapeDtypeStruct((rows, LANE), out_dtype),
        grid=grid,
        in_specs=[
            pl.BlockSpec(memory_space=pltpu.SMEM),                 # params (replicated)
            pl.BlockSpec((tile_rows, LANE), lambda i: (i, 0)),     # x tile
        ],
        out_specs=pl.BlockSpec((tile_rows, LANE), lambda i: (i, 0)),
        compiler_params=pltpu.CompilerParams(
            dimension_semantics=("parallel",),
            vmem_limit_bytes=32 * 1024 * 1024,
        ),
    )(params, x2d)

    if needs_unpad:
        return out2d.reshape(-1)[:n].reshape(orig_shape)
    return out2d.reshape(orig_shape)


def _lrelu(v):
    return jnp.where(v >= 0, v, NEG_SLOPE * v)


def _ref(x, w_jl, b_jl, w_tp, b_tp, w_qkv, b_qkv, w_c, b_c):
    jl = x * w_jl.reshape(()) + b_jl.reshape(())
    te = _lrelu(x * w_tp.reshape(()) + b_tp.reshape(()))
    z = jl + te
    h = _lrelu(z * w_qkv.reshape(()) + b_qkv.reshape(()))
    return h * w_c.reshape(()) + b_c.reshape(())


if __name__ == "__main__":
    key = jax.random.PRNGKey(0)
    keys = jax.random.split(key, 10)

    def unif(k, shape):
        # Mimics nn.Linear's uniform init: bound = 1/sqrt(in_features) = 1.
        return jax.random.uniform(k, shape, minval=-1.0, maxval=1.0,
                                  dtype=jnp.float32)

    w_jl = unif(keys[1], (1, 1))
    b_jl = unif(keys[2], (1,))
    w_tp = unif(keys[3], (1, 1))
    b_tp = unif(keys[4], (1,))
    w_qkv = unif(keys[5], (1, 1))
    b_qkv = unif(keys[6], (1,))
    w_c = unif(keys[7], (1, 1))
    b_c = unif(keys[8], (1,))
    params = (w_jl, b_jl, w_tp, b_tp, w_qkv, b_qkv, w_c, b_c)

    # Fast path (n % 128 == 0 -> no pad / no output slice) and general path.
    x_fast = jax.random.normal(keys[0], (2, 8, 8, 1), dtype=jnp.float32)
    x_gen = jax.random.normal(keys[9], (2, 8, 1), dtype=jnp.float32)

    for x in (x_fast, x_gen):
        out = jax.block_until_ready(a_forward(x, *params))
        expected = _ref(x, *params)
        assert out.shape == x.shape
        assert out.dtype == x.dtype
        assert jnp.allclose(out, expected, atol=1e-6, rtol=1e-6)

    print("KERNEL_OK")
</pallas_src>

<mosaic_0001>
module attributes {stable_mosaic.version = 11 : i64} {
  func.func @a_forward_kernel(%arg0: i32, %arg1: memref<8xf32, #tpu.memory_space<smem>>, %arg2: memref<1x128xf32, #tpu.memory_space<vmem>>, %arg3: memref<1x128xf32, #tpu.memory_space<vmem>>) attributes {dimension_semantics = [#tpu.dimension_semantics<parallel>], iteration_bounds = array<i64: 1>, scalar_prefetch = 0 : i64, scratch_operands = 0 : i64, tpu.core_type = #tpu.core_type<tc>, window_params = [{transform_indices = @transform_0, window_bounds = array<i64: 8>}, {transform_indices = @transform_1, window_bounds = array<i64: 1, 128>}, {transform_indices = @transform_2, window_bounds = array<i64: 1, 128>}]} {
    %c0 = arith.constant 0 : index
    %0 = memref.load %arg1[%c0] : memref<8xf32, #tpu.memory_space<smem>>
    %c1 = arith.constant 1 : index
    %1 = memref.load %arg1[%c1] : memref<8xf32, #tpu.memory_space<smem>>
    %c2 = arith.constant 2 : index
    %2 = memref.load %arg1[%c2] : memref<8xf32, #tpu.memory_space<smem>>
    %c3 = arith.constant 3 : index
    %3 = memref.load %arg1[%c3] : memref<8xf32, #tpu.memory_space<smem>>
    %c4 = arith.constant 4 : index
    %4 = memref.load %arg1[%c4] : memref<8xf32, #tpu.memory_space<smem>>
    %c5 = arith.constant 5 : index
    %5 = memref.load %arg1[%c5] : memref<8xf32, #tpu.memory_space<smem>>
    %c6 = arith.constant 6 : index
    %6 = memref.load %arg1[%c6] : memref<8xf32, #tpu.memory_space<smem>>
    %c7 = arith.constant 7 : index
    %7 = memref.load %arg1[%c7] : memref<8xf32, #tpu.memory_space<smem>>
    %c0_0 = arith.constant 0 : index
    %c0_1 = arith.constant 0 : index
    %8 = vector.load %arg2[%c0_0, %c0_1] : memref<1x128xf32, #tpu.memory_space<vmem>>, vector<1x128xf32>
    %9 = vector.broadcast %2 : f32 to vector<1x128xf32>
    %10 = arith.mulf %8, %9 : vector<1x128xf32>
    %11 = vector.broadcast %3 : f32 to vector<1x128xf32>
    %12 = arith.addf %10, %11 : vector<1x128xf32>
    %cst = arith.constant 0.000000e+00 : f32
    %13 = vector.broadcast %cst : f32 to vector<1x128xf32>
    %14 = arith.cmpf oge, %12, %13 : vector<1x128xf32>
    %cst_2 = arith.constant 0.00999999977 : f32
    %15 = vector.broadcast %cst_2 : f32 to vector<1x128xf32>
    %16 = arith.mulf %15, %12 : vector<1x128xf32>
    %17 = arith.select %14, %12, %16 : vector<1x128xi1>, vector<1x128xf32>
    %18 = vector.broadcast %0 : f32 to vector<1x128xf32>
    %19 = arith.mulf %8, %18 : vector<1x128xf32>
    %20 = vector.broadcast %1 : f32 to vector<1x128xf32>
    %21 = arith.addf %19, %20 : vector<1x128xf32>
    %22 = arith.addf %21, %17 : vector<1x128xf32>
    %23 = vector.broadcast %4 : f32 to vector<1x128xf32>
    %24 = arith.mulf %22, %23 : vector<1x128xf32>
    %25 = vector.broadcast %5 : f32 to vector<1x128xf32>
    %26 = arith.addf %24, %25 : vector<1x128xf32>
    %cst_3 = arith.constant 0.000000e+00 : f32
    %27 = vector.broadcast %cst_3 : f32 to vector<1x128xf32>
    %28 = arith.cmpf oge, %26, %27 : vector<1x128xf32>
    %cst_4 = arith.constant 0.00999999977 : f32
    %29 = vector.broadcast %cst_4 : f32 to vector<1x128xf32>
    %30 = arith.mulf %29, %26 : vector<1x128xf32>
    %31 = arith.select %28, %26, %30 : vector<1x128xi1>, vector<1x128xf32>
    %32 = vector.broadcast %6 : f32 to vector<1x128xf32>
    %33 = arith.mulf %31, %32 : vector<1x128xf32>
    %34 = vector.broadcast %7 : f32 to vector<1x128xf32>
    %35 = arith.addf %33, %34 : vector<1x128xf32>
    %c0_5 = arith.constant 0 : index
    %c0_6 = arith.constant 0 : index
    %36 = vector.load %arg3[%c0_5, %c0_6] : memref<1x128xf32, #tpu.memory_space<vmem>>, vector<1x128xf32>
    tpu.vector_store %arg3[%c0_5, %c0_6], %35 {strides = array<i32>} : memref<1x128xf32, #tpu.memory_space<vmem>>, vector<1x128xf32>,
    return
  }
  func.func @transform_0(%arg0: i32) -> i32 {
    %c0_i32 = arith.constant 0 : i32
    %c0_i32_0 = arith.constant 0 : i32
    return %c0_i32 : i32
  }
  func.func @transform_1(%arg0: i32) -> (i32, i32) {
    %c0_i32 = arith.constant 0 : i32
    %c0_i32_0 = arith.constant 0 : i32
    return %arg0, %c0_i32 : i32, i32
  }
  func.func @transform_2(%arg0: i32) -> (i32, i32) {
    %c0_i32 = arith.constant 0 : i32
    %c0_i32_0 = arith.constant 0 : i32
    return %arg0, %c0_i32 : i32, i32
  }
}

</mosaic_0001>

<bundles_post_ra>
// kernel: tpu_custom_call.1
= control target key start
LH: loop header
LB: loop body
LE: loop exit
PB: predicated region body
PF: predicated region fallthrough
CT: control target
= control target key end

     0   :  { %7 = vsyncpa [#allocation4], 0  ;;  %s160_s0 = inlined_call_operand.hbm [shape: f32[8], index: 0, kind: input, shape index: {}]   ;;  %s161_s1 = inlined_call_operand.vmem [shape: f32[1,128], index: 1, kind: input, shape index: {}]   ;;  %s162_s2 = inlined_call_operand.hbm [shape: f32[1,128], index: 2, kind: output, shape index: {}]  }
   0x1   :  { %8 = vsyncpa [#allocation3], 0  ;;  %s80_s11 = scalar_lea.hbm %s160_s0, 16 }
   0x2   :  { %p81_p0 = scmp.ne.s32.totalorder %s160_s0, %s80_s11  ;;  %p84_p1 = scmp.lt.u32.totalorder %s80_s11, %s160_s0 }
   0x4   :  { %p86_p2 = pnand %p84_p1, %p81_p0 }
   0x6   :  { %89 = shalt.err (!%p86_p2)
}
   0x7   :  { %s116_s16 = smov [#allocation2]  }
   0x8   :  { %16 = dma.hbm_to_smem %s160_s0, 16, %s116_s16, [#allocation4]  }
   0x9   :  { %112 = dma.done.wait [#allocation4], 16  }
   0xa   :  { %113 = vsyncadd [#allocation4], 4294967280 }
   0xb   :  { %22 = sfence }
   0xc   :  { %s23_s19 = sld [smem:[#allocation2]]  ;;  %s71_s20 = sld [smem:[#allocation2 + $0x1]]  ;;  %v31_v0 = vld [vmem:[%s161_s1] sm:$0x1] }
   0xd   :  { %s72_s21 = sld [smem:[#allocation2 + $0x2]]  ;;  %s73_s22 = sld [smem:[#allocation2 + $0x3]] }
   0xe   :  { %s74_s25 = sld [smem:[#allocation2 + $0x4]]  ;;  %s75_s26 = sld [smem:[#allocation2 + $0x5]] }
   0xf   :  { %s76_s0 = sld [smem:[#allocation2 + $0x6]]  ;;  %s77_s27 = sld [smem:[#allocation2 + $0x7]] }
  0x10   :  { %s117_s1 = smov [#allocation5]  }
  0x11   :  { %s62_s28 = sshll.u32 %s117_s1, 4  ;;  %s63_s28 = int_to_ptr.vmem [resolvable:$true] %s62_s28 }
  0x12   :  { %v39_v1 = vstv %s23_s19  ;;  %v41_v6 = vstv %s71_s20  ;;  %s90_s29 = scalar_lea.vmem %s63_s28, 16  ;;  %s94_s30 = scalar_lea.vmem %s63_s28, 32 }
  0x13   :  { %v32_v2 = vstv %s72_s21  ;;  %v34_v3 = vstv %s73_s22  ;;  %v40_v4 = vmul.f32 %v39_v1, %v31_v0  ;;  %p91_p3 = scmp.ne.s32.totalorder %s63_s28, %s90_s29  ;;  %p95_p4 = scmp.lt.s32.totalorder %s63_s28, %s63_s28 }
  0x14   :  { %v33_v5 = vmul.f32 %v32_v2, %v31_v0  ;;  %v44_v11 = vstv %s74_s25  ;;  %v46_v13 = vstv %s75_s26  ;;  %p96_p5 = scmp.lt.s32.totalorder %s94_s30, %s90_s29 }
  0x15   :  { %v42_v8 = vadd.f32 %v41_v6, %v40_v4  ;;  %v51_v17 = vstv %s76_s0  ;;  %v53_v19 = vstv %s77_s27 }
  0x16   :  { %v35_v7 = vadd.f32 %v34_v3, %v33_v5  ;;  %p97_p6 = por %p96_p5, %p95_p4 }
  0x18   :  { %vm36_vm0 = vcmp.ge.f32.partialorder %v35_v7, 0.0  ;;  %v37_v9 = vmul.f32 0.01, %v35_v7  ;;  %p98_p7 = pnand %p97_p6, %p91_p3 }
  0x1a   :  { %v38_v10 = vsel %vm36_vm0, %v35_v7, %v37_v9 }
  0x1b   :  { %v43_v12 = vadd.f32 %v42_v8, %v38_v10 }
  0x1d   :  { %v45_v14 = vmul.f32 %v44_v11, %v43_v12 }
  0x1f   :  { %v47_v15 = vadd.f32 %v46_v13, %v45_v14 }
  0x21   :  { %vm48_vm1 = vcmp.ge.f32.partialorder %v47_v15, 0.0  ;;  %v49_v16 = vmul.f32 0.01, %v47_v15 }
  0x23   :  { %v50_v18 = vsel %vm48_vm1, %v47_v15, %v49_v16 }
  0x24   :  { %v52_v20 = vmul.f32 %v51_v17, %v50_v18 }
  0x26   :  { %v54_v21 = vadd.f32 %v53_v19, %v52_v20 }
  0x28   :  { %55 = vst [vmem:[#allocation5] sm:$0x1] %v54_v21 }
  0x29   :  { %101 = shalt.err (!%p98_p7)
}
  0x2a   :  { %s102_s5 = scalar_lea.hbm %s162_s2, 16 }
  0x2b   :  { %p103_p8 = scmp.ne.s32.totalorder %s162_s2, %s102_s5  ;;  %p106_p9 = scmp.lt.u32.totalorder %s102_s5, %s162_s2 }
  0x2d   :  { %p108_p10 = pnand %p106_p9, %p103_p8 }
  0x2f   :  { %111 = shalt.err (!%p108_p10)
}
  0x30   :  { %65 = dma.vmem_to_hbm [thread:$0]  %s63_s28, 16, %s162_s2, [#allocation3]  }
  0x31   :  { %114 = dma.done.wait [#allocation3], 16  }
  0x32   :  { %115 = vsyncadd [#allocation3], 4294967280 }
  0x33   :  { %69 = vsyncpa [#allocation3], 1 }
  0x34   :  { %70 = vsyncpa [#allocation4], 1 }

</bundles_post_ra>
